<compile_context>
chip_gen: v7x
topology: tpu7x:2x2x1
jax: 0.10.0
libtpu: 0.0.40
codegen_flags: <defaults>
</compile_context>

<pallas_src>
import math

import jax
import jax.numpy as jnp
from jax import lax
from jax.experimental import pallas as pl
from jax.experimental.pallas import tpu as pltpu


def _round_up(n, m):
    return ((n + m - 1) // m) * m


def _make_kernel(B, L, D, P, n_pad):
    """Build the fused two-layer kernel for static (B, L, D, P, n_pad)."""

    def kernel(x_ref, pos_ref, aw1_ref, w2_ref, bias_ref, o_ref):
        # x_ref:    (B*L, D)        batch folded into rows
        # pos_ref:  (B*L, 2*D)      [pos1 tiled | pos2 tiled]
        # aw1_ref:  (D, 2*(D+P))    [A1 | W1_l1 | A2 | W1_l2],  A = Q K^T / sqrt(D)
        # w2_ref:   (P, n_pad + D)  [W2_l2 zero-padded to n_pad | W2_l1]
        # bias_ref: (8, n_pad)      rows: b1_l1 | b2_l1 | b1_l2 | b2_l2 (zero-padded)
        # o_ref:    (B*L, n_pad)    lane-dense padded output (sliced in the wrapper)
        x = x_ref[...]                                                # (BL, D)

        def layer(x_in, pos, A, W1, b1, W2, b2):
            h = x_in + pos                                            # x_sem + x_pos
            qa = jnp.dot(h, A, preferred_element_type=jnp.float32)    # (BL, D); scale folded in A
            attn = []
            for b in range(B):                                        # static unroll (B tiny)
                s = slice(b * L, (b + 1) * L)                         # sublane-aligned (L=8)
                # scores = (h A) h^T : contract the shared last dim, no key transpose.
                scores = lax.dot_general(
                    qa[s], h[s], dimension_numbers=(((1,), (1,)), ((), ())),
                    preferred_element_type=jnp.float32)               # (L, L)
                m = jnp.max(scores, axis=-1, keepdims=True)
                e = jnp.exp(scores - m)
                probs = e * pl.reciprocal(jnp.sum(e, axis=-1, keepdims=True), approx=True)
                attn.append(jnp.dot(probs, x_in[s],
                                    preferred_element_type=jnp.float32))   # attn_probs @ x_sem
            y = jnp.concatenate(attn, axis=0) + x_in                  # residual, (BL, D)
            ff = jnp.dot(y, W1, preferred_element_type=jnp.float32) + b1
            ff = jnp.maximum(ff, 0.0)                                 # ReLU
            return jnp.dot(ff, W2, preferred_element_type=jnp.float32) + b2

        # Static slices of the packed slabs (zero-cost views, loaded on use).
        A1  = aw1_ref[:, 0:D]
        W11 = aw1_ref[:, D:D + P]
        A2  = aw1_ref[:, D + P:2 * D + P]
        W12 = aw1_ref[:, 2 * D + P:2 * (D + P)]
        W22 = w2_ref[:, :n_pad]                    # layer2 fc2 (lane-dense, zero-padded)
        W21 = w2_ref[:, n_pad:n_pad + D]           # layer1 fc2
        b11 = bias_ref[0:1, :P]
        b21 = bias_ref[1:2, :D]                    # layer1: n_classes == model_dim
        b12 = bias_ref[2:3, :P]
        b22 = bias_ref[3:4, :]                     # zero past n_classes

        h1  = layer(x,  pos_ref[:, :D],       A1, W11, b11, W21, b21)   # (BL, D)
        out = layer(h1, pos_ref[:, D:2 * D],  A2, W12, b12, W22, b22)   # (BL, n_pad)
        o_ref[...] = out.astype(o_ref.dtype)

    return kernel


def pack_params(params1, params2, B, L):
    """One-time packing of Transformer2Layer parameters into lane-dense kernel slabs.

    Runs at parameter-construction time (not per forward): folds Q,K and the 1/sqrt(D)
    scale into A, tiles the positional embeddings across the batch, pads layer2's fc2 to a
    lane-dense width, and packs the four biases into a single (8, n_pad) tile.
    """
    D = params1["Q"].shape[0]
    P = params1["W1"].shape[1]
    n_out = params2["W2"].shape[1]
    n_pad = _round_up(max(D, P, n_out), 128)
    scale = 1.0 / math.sqrt(D)

    def fold_qk(prm):                        # A = Q K^T / sqrt(D)
        return (prm["Q"] @ prm["K"].T) * scale

    def tile_pos(prm):                       # (L, D) -> (B*L, D)
        return jnp.tile(prm["pos"], (B, 1))

    pos_slab = jnp.concatenate([tile_pos(params1), tile_pos(params2)], axis=1)   # (BL, 2D)
    aw1_slab = jnp.concatenate(
        [fold_qk(params1), params1["W1"], fold_qk(params2), params2["W1"]], axis=1)  # (D, 2(D+P))
    w22_pad = jnp.pad(params2["W2"], ((0, 0), (0, n_pad - n_out)))
    w2_slab = jnp.concatenate([w22_pad, params1["W2"]], axis=1)                  # (P, n_pad+D)

    def row(v):
        v = jnp.asarray(v).reshape(-1)
        return jnp.pad(v, (0, n_pad - v.shape[0]))

    bias_slab = jnp.stack([row(params1["b1"]), row(params1["b2"]),
                           row(params2["b1"]), row(params2["b2"])])
    bias_slab = jnp.pad(bias_slab, ((0, 8 - bias_slab.shape[0]), (0, 0)))        # (8, n_pad)

    meta = dict(B=B, L=L, D=D, P=P, n_pad=n_pad, n_out=n_out)
    packed = tuple(jax.device_put(s) for s in (pos_slab, aw1_slab, w2_slab, bias_slab))
    return packed, meta


def transformer2layer(x, packed, meta):
    """Transformer2Layer.forward: layer2(layer1(x)), fully fused, single kernel invocation."""
    B, L, D, P, n_pad, n_out = (meta[k] for k in ("B", "L", "D", "P", "n_pad", "n_out"))
    assert x.shape == (B, L, D), x.shape
    pos_slab, aw1_slab, w2_slab, bias_slab = packed

    vmem = lambda: pl.BlockSpec(memory_space=pltpu.MemorySpace.VMEM)
    out = pl.pallas_call(
        _make_kernel(B, L, D, P, n_pad),
        out_shape=jax.ShapeDtypeStruct((B * L, n_pad), jnp.float32),
        in_specs=[vmem() for _ in range(5)],
        out_specs=vmem(),
    )(x.reshape(B * L, D), pos_slab, aw1_slab, w2_slab, bias_slab)

    return out.reshape(B, L, n_pad)[:, :, :n_out]


# ---------------- parameter construction (deterministic, synthetic) ----------------
def _init_layer_params(key, model_dim, p, n_out, L):
    ks = jax.random.split(key, 7)
    # kaiming_uniform(a=sqrt(5)) bound on a (D, D) matrix -> uniform(+-1/sqrt(D))
    bq = 1.0 / math.sqrt(model_dim)
    Q = jax.random.uniform(ks[0], (model_dim, model_dim), jnp.float32, -bq, bq)
    K = jax.random.uniform(ks[1], (model_dim, model_dim), jnp.float32, -bq, bq)
    # nn.Embedding default init: N(0, 1)
    pos = jax.random.normal(ks[2], (L, model_dim), jnp.float32)
    # nn.Linear default init: uniform(+-1/sqrt(fan_in)); stored pre-transposed (in, out)
    b1lim = 1.0 / math.sqrt(model_dim)
    W1 = jax.random.uniform(ks[3], (model_dim, p), jnp.float32, -b1lim, b1lim)
    b1 = jax.random.uniform(ks[4], (1, p), jnp.float32, -b1lim, b1lim)
    b2lim = 1.0 / math.sqrt(p)
    W2 = jax.random.uniform(ks[5], (p, n_out), jnp.float32, -b2lim, b2lim)
    b2 = jax.random.uniform(ks[6], (1, n_out), jnp.float32, -b2lim, b2lim)
    return dict(pos=pos, Q=Q, K=K, W1=W1, b1=b1, W2=W2, b2=b2)


def _ref_layer(x, prm):
    """Pure-JAX reference for one TransformerSeq2Seq layer (unfused original math)."""
    D = x.shape[-1]
    h = x + prm["pos"][None]
    qx = h @ prm["Q"]
    kx = h @ prm["K"]
    scores = jnp.einsum("bld,bmd->blm", qx, kx) / math.sqrt(D)
    probs = jax.nn.softmax(scores, axis=-1)
    a = jnp.einsum("blm,bmd->bld", probs, x)
    y = a + x
    b = jax.nn.relu(y @ prm["W1"] + prm["b1"])
    return b @ prm["W2"] + prm["b2"]


if __name__ == "__main__":
    # Small shapes implied by the module: model_dim=32, p=32, n_classes=8, L (seq)=8, batch=2.
    B, L, D, P, N_CLASSES = 2, 8, 32, 32, 8

    key = jax.random.PRNGKey(0)
    k_x, k_l1, k_l2 = jax.random.split(key, 3)

    # is_embedded=True: input is already an embedded sequence (B, L, D)
    x = jax.random.normal(k_x, (B, L, D), jnp.float32)

    params1 = _init_layer_params(k_l1, D, P, D, L)          # layer1: n_classes = model_dim
    params2 = _init_layer_params(k_l2, D, P, N_CLASSES, L)  # layer2: n_classes = N_CLASSES

    # One-time packing (all per-call wrapper prep hoisted here).
    packed, meta = pack_params(params1, params2, B, L)

    out = transformer2layer(x, packed, meta)
    out = jax.block_until_ready(out)

    ref = _ref_layer(_ref_layer(x, params1), params2)
    assert out.shape == (B, L, N_CLASSES), out.shape
    assert jnp.allclose(out, ref, atol=1e-2, rtol=1e-2), "mismatch vs pure-JAX reference"

    print("KERNEL_OK")
</pallas_src>

<mosaic_0001>
module attributes {stable_mosaic.version = 11 : i64} {
  func.func @kernel(%arg0: memref<16x32xf32, #tpu.memory_space<vmem>>, %arg1: memref<16x64xf32, #tpu.memory_space<vmem>>, %arg2: memref<32x128xf32, #tpu.memory_space<vmem>>, %arg3: memref<32x160xf32, #tpu.memory_space<vmem>>, %arg4: memref<8x128xf32, #tpu.memory_space<vmem>>, %arg5: memref<16x128xf32, #tpu.memory_space<vmem>>) attributes {dimension_semantics = [], scalar_prefetch = 0 : i64, scratch_operands = 0 : i64, tpu.core_type = #tpu.core_type<tc>} {
    %c0 = arith.constant 0 : index
    %c0_0 = arith.constant 0 : index
    %0 = vector.load %arg0[%c0, %c0_0] : memref<16x32xf32, #tpu.memory_space<vmem>>, vector<16x32xf32>
    %c0_1 = arith.constant 0 : index
    %c0_2 = arith.constant 0 : index
    %1 = vector.load %arg2[%c0_1, %c0_2] : memref<32x128xf32, #tpu.memory_space<vmem>>, vector<32x32xf32>
    %c0_3 = arith.constant 0 : index
    %c32 = arith.constant 32 : index
    %2 = vector.load %arg2[%c0_3, %c32] : memref<32x128xf32, #tpu.memory_space<vmem>>, vector<32x32xf32>
    %c0_4 = arith.constant 0 : index
    %c64 = arith.constant 64 : index
    %3 = vector.load %arg2[%c0_4, %c64] : memref<32x128xf32, #tpu.memory_space<vmem>>, vector<32x32xf32>
    %c0_5 = arith.constant 0 : index
    %c96 = arith.constant 96 : index
    %4 = vector.load %arg2[%c0_5, %c96] : memref<32x128xf32, #tpu.memory_space<vmem>>, vector<32x32xf32>
    %c0_6 = arith.constant 0 : index
    %c0_7 = arith.constant 0 : index
    %5 = vector.load %arg3[%c0_6, %c0_7] : memref<32x160xf32, #tpu.memory_space<vmem>>, vector<32x128xf32>
    %c0_8 = arith.constant 0 : index
    %c128 = arith.constant 128 : index
    %6 = vector.load %arg3[%c0_8, %c128] : memref<32x160xf32, #tpu.memory_space<vmem>>, vector<32x32xf32>
    %c0_9 = arith.constant 0 : index
    %c0_10 = arith.constant 0 : index
    %7 = vector.load %arg4[%c0_9, %c0_10] : memref<8x128xf32, #tpu.memory_space<vmem>>, vector<1x32xf32>
    %c1 = arith.constant 1 : index
    %c0_11 = arith.constant 0 : index
    %8 = vector.load %arg4[%c1, %c0_11] : memref<8x128xf32, #tpu.memory_space<vmem>>, vector<1x32xf32>
    %c2 = arith.constant 2 : index
    %c0_12 = arith.constant 0 : index
    %9 = vector.load %arg4[%c2, %c0_12] : memref<8x128xf32, #tpu.memory_space<vmem>>, vector<1x32xf32>
    %c3 = arith.constant 3 : index
    %c0_13 = arith.constant 0 : index
    %10 = vector.load %arg4[%c3, %c0_13] : memref<8x128xf32, #tpu.memory_space<vmem>>, vector<1x128xf32>
    %c0_14 = arith.constant 0 : index
    %c0_15 = arith.constant 0 : index
    %11 = vector.load %arg1[%c0_14, %c0_15] : memref<16x64xf32, #tpu.memory_space<vmem>>, vector<16x32xf32>
    %12 = arith.addf %0, %11 : vector<16x32xf32>
    %cst = arith.constant dense<0.000000e+00> : vector<16x32xf32>
    %13 = tpu.matmul %12, %1, %cst {dimension_numbers = #tpu.dot_dimension_numbers<[1], [0], [0], [1], [0, 0, 1, 1], [], []>} : vector<16x32xf32>, vector<32x32xf32>, vector<16x32xf32> -> vector<16x32xf32>
    %14 = vector.extract_strided_slice %13 {offsets = [0, 0], sizes = [8, 32], strides = [1, 1]} : vector<16x32xf32> to vector<8x32xf32>
    %15 = vector.extract_strided_slice %12 {offsets = [0, 0], sizes = [8, 32], strides = [1, 1]} : vector<16x32xf32> to vector<8x32xf32>
    %cst_16 = arith.constant dense<0.000000e+00> : vector<8x8xf32>
    %16 = tpu.matmul %14, %15, %cst_16 {dimension_numbers = #tpu.dot_dimension_numbers<[1], [1], [0], [0], [0, 0, 1, 0], [], []>} : vector<8x32xf32>, vector<8x32xf32>, vector<8x8xf32> -> vector<8x8xf32>
    %cst_17 = arith.constant dense<0xFF800000> : vector<8xf32>
    %17 = vector.multi_reduction <maximumf>, %16, %cst_17 [1] : vector<8x8xf32> to vector<8xf32>
    %18 = vector.shape_cast %17 : vector<8xf32> to vector<8x1xf32>
    %19 = vector.broadcast %18 : vector<8x1xf32> to vector<8x8xf32>
    %20 = arith.subf %16, %19 : vector<8x8xf32>
    %21 = math.exp %20 : vector<8x8xf32>
    %cst_18 = arith.constant dense<0.000000e+00> : vector<8xf32>
    %22 = vector.multi_reduction <add>, %21, %cst_18 [1] : vector<8x8xf32> to vector<8xf32>
    %23 = vector.shape_cast %22 : vector<8xf32> to vector<8x1xf32>
    %24 = tpu.reciprocal %23 {approx = true} : vector<8x1xf32> -> vector<8x1xf32>
    %25 = vector.broadcast %24 : vector<8x1xf32> to vector<8x8xf32>
    %26 = arith.mulf %21, %25 : vector<8x8xf32>
    %27 = vector.extract_strided_slice %0 {offsets = [0, 0], sizes = [8, 32], strides = [1, 1]} : vector<16x32xf32> to vector<8x32xf32>
    %cst_19 = arith.constant dense<0.000000e+00> : vector<8x32xf32>
    %28 = tpu.matmul %26, %27, %cst_19 {dimension_numbers = #tpu.dot_dimension_numbers<[1], [0], [0], [1], [0, 0, 1, 1], [], []>} : vector<8x8xf32>, vector<8x32xf32>, vector<8x32xf32> -> vector<8x32xf32>
    %29 = vector.extract_strided_slice %13 {offsets = [8, 0], sizes = [8, 32], strides = [1, 1]} : vector<16x32xf32> to vector<8x32xf32>
    %30 = vector.extract_strided_slice %12 {offsets = [8, 0], sizes = [8, 32], strides = [1, 1]} : vector<16x32xf32> to vector<8x32xf32>
    %cst_20 = arith.constant dense<0.000000e+00> : vector<8x8xf32>
    %31 = tpu.matmul %29, %30, %cst_20 {dimension_numbers = #tpu.dot_dimension_numbers<[1], [1], [0], [0], [0, 0, 1, 0], [], []>} : vector<8x32xf32>, vector<8x32xf32>, vector<8x8xf32> -> vector<8x8xf32>
    %cst_21 = arith.constant dense<0xFF800000> : vector<8xf32>
    %32 = vector.multi_reduction <maximumf>, %31, %cst_21 [1] : vector<8x8xf32> to vector<8xf32>
    %33 = vector.shape_cast %32 : vector<8xf32> to vector<8x1xf32>
    %34 = vector.broadcast %33 : vector<8x1xf32> to vector<8x8xf32>
    %35 = arith.subf %31, %34 : vector<8x8xf32>
    %36 = math.exp %35 : vector<8x8xf32>
    %cst_22 = arith.constant dense<0.000000e+00> : vector<8xf32>
    %37 = vector.multi_reduction <add>, %36, %cst_22 [1] : vector<8x8xf32> to vector<8xf32>
    %38 = vector.shape_cast %37 : vector<8xf32> to vector<8x1xf32>
    %39 = tpu.reciprocal %38 {approx = true} : vector<8x1xf32> -> vector<8x1xf32>
    %40 = vector.broadcast %39 : vector<8x1xf32> to vector<8x8xf32>
    %41 = arith.mulf %36, %40 : vector<8x8xf32>
    %42 = vector.extract_strided_slice %0 {offsets = [8, 0], sizes = [8, 32], strides = [1, 1]} : vector<16x32xf32> to vector<8x32xf32>
    %cst_23 = arith.constant dense<0.000000e+00> : vector<8x32xf32>
    %43 = tpu.matmul %41, %42, %cst_23 {dimension_numbers = #tpu.dot_dimension_numbers<[1], [0], [0], [1], [0, 0, 1, 1], [], []>} : vector<8x8xf32>, vector<8x32xf32>, vector<8x32xf32> -> vector<8x32xf32>
    %44 = tpu.concatenate %28, %43 in 0 : vector<8x32xf32>, vector<8x32xf32> -> vector<16x32xf32>
    %45 = arith.addf %44, %0 : vector<16x32xf32>
    %cst_24 = arith.constant dense<0.000000e+00> : vector<16x32xf32>
    %46 = tpu.matmul %45, %2, %cst_24 {dimension_numbers = #tpu.dot_dimension_numbers<[1], [0], [0], [1], [0, 0, 1, 1], [], []>} : vector<16x32xf32>, vector<32x32xf32>, vector<16x32xf32> -> vector<16x32xf32>
    %47 = vector.broadcast %7 : vector<1x32xf32> to vector<16x32xf32>
    %48 = arith.addf %46, %47 : vector<16x32xf32>
    %cst_25 = arith.constant 0.000000e+00 : f32
    %49 = vector.broadcast %cst_25 : f32 to vector<16x32xf32>
    %50 = arith.maximumf %48, %49 : vector<16x32xf32>
    %cst_26 = arith.constant dense<0.000000e+00> : vector<16x32xf32>
    %51 = tpu.matmul %50, %6, %cst_26 {dimension_numbers = #tpu.dot_dimension_numbers<[1], [0], [0], [1], [0, 0, 1, 1], [], []>} : vector<16x32xf32>, vector<32x32xf32>, vector<16x32xf32> -> vector<16x32xf32>
    %52 = vector.broadcast %8 : vector<1x32xf32> to vector<16x32xf32>
    %53 = arith.addf %51, %52 : vector<16x32xf32>
    %c0_27 = arith.constant 0 : index
    %c32_28 = arith.constant 32 : index
    %54 = vector.load %arg1[%c0_27, %c32_28] : memref<16x64xf32, #tpu.memory_space<vmem>>, vector<16x32xf32>
    %55 = arith.addf %53, %54 : vector<16x32xf32>
    %cst_29 = arith.constant dense<0.000000e+00> : vector<16x32xf32>
    %56 = tpu.matmul %55, %3, %cst_29 {dimension_numbers = #tpu.dot_dimension_numbers<[1], [0], [0], [1], [0, 0, 1, 1], [], []>} : vector<16x32xf32>, vector<32x32xf32>, vector<16x32xf32> -> vector<16x32xf32>
    %57 = vector.extract_strided_slice %56 {offsets = [0, 0], sizes = [8, 32], strides = [1, 1]} : vector<16x32xf32> to vector<8x32xf32>
    %58 = vector.extract_strided_slice %55 {offsets = [0, 0], sizes = [8, 32], strides = [1, 1]} : vector<16x32xf32> to vector<8x32xf32>
    %cst_30 = arith.constant dense<0.000000e+00> : vector<8x8xf32>
    %59 = tpu.matmul %57, %58, %cst_30 {dimension_numbers = #tpu.dot_dimension_numbers<[1], [1], [0], [0], [0, 0, 1, 0], [], []>} : vector<8x32xf32>, vector<8x32xf32>, vector<8x8xf32> -> vector<8x8xf32>
    %cst_31 = arith.constant dense<0xFF800000> : vector<8xf32>
    %60 = vector.multi_reduction <maximumf>, %59, %cst_31 [1] : vector<8x8xf32> to vector<8xf32>
    %61 = vector.shape_cast %60 : vector<8xf32> to vector<8x1xf32>
    %62 = vector.broadcast %61 : vector<8x1xf32> to vector<8x8xf32>
    %63 = arith.subf %59, %62 : vector<8x8xf32>
    %64 = math.exp %63 : vector<8x8xf32>
    %cst_32 = arith.constant dense<0.000000e+00> : vector<8xf32>
    %65 = vector.multi_reduction <add>, %64, %cst_32 [1] : vector<8x8xf32> to vector<8xf32>
    %66 = vector.shape_cast %65 : vector<8xf32> to vector<8x1xf32>
    %67 = tpu.reciprocal %66 {approx = true} : vector<8x1xf32> -> vector<8x1xf32>
    %68 = vector.broadcast %67 : vector<8x1xf32> to vector<8x8xf32>
    %69 = arith.mulf %64, %68 : vector<8x8xf32>
    %70 = vector.extract_strided_slice %53 {offsets = [0, 0], sizes = [8, 32], strides = [1, 1]} : vector<16x32xf32> to vector<8x32xf32>
    %cst_33 = arith.constant dense<0.000000e+00> : vector<8x32xf32>
    %71 = tpu.matmul %69, %70, %cst_33 {dimension_numbers = #tpu.dot_dimension_numbers<[1], [0], [0], [1], [0, 0, 1, 1], [], []>} : vector<8x8xf32>, vector<8x32xf32>, vector<8x32xf32> -> vector<8x32xf32>
    %72 = vector.extract_strided_slice %56 {offsets = [8, 0], sizes = [8, 32], strides = [1, 1]} : vector<16x32xf32> to vector<8x32xf32>
    %73 = vector.extract_strided_slice %55 {offsets = [8, 0], sizes = [8, 32], strides = [1, 1]} : vector<16x32xf32> to vector<8x32xf32>
    %cst_34 = arith.constant dense<0.000000e+00> : vector<8x8xf32>
    %74 = tpu.matmul %72, %73, %cst_34 {dimension_numbers = #tpu.dot_dimension_numbers<[1], [1], [0], [0], [0, 0, 1, 0], [], []>} : vector<8x32xf32>, vector<8x32xf32>, vector<8x8xf32> -> vector<8x8xf32>
    %cst_35 = arith.constant dense<0xFF800000> : vector<8xf32>
    %75 = vector.multi_reduction <maximumf>, %74, %cst_35 [1] : vector<8x8xf32> to vector<8xf32>
    %76 = vector.shape_cast %75 : vector<8xf32> to vector<8x1xf32>
    %77 = vector.broadcast %76 : vector<8x1xf32> to vector<8x8xf32>
    %78 = arith.subf %74, %77 : vector<8x8xf32>
    %79 = math.exp %78 : vector<8x8xf32>
    %cst_36 = arith.constant dense<0.000000e+00> : vector<8xf32>
    %80 = vector.multi_reduction <add>, %79, %cst_36 [1] : vector<8x8xf32> to vector<8xf32>
    %81 = vector.shape_cast %80 : vector<8xf32> to vector<8x1xf32>
    %82 = tpu.reciprocal %81 {approx = true} : vector<8x1xf32> -> vector<8x1xf32>
    %83 = vector.broadcast %82 : vector<8x1xf32> to vector<8x8xf32>
    %84 = arith.mulf %79, %83 : vector<8x8xf32>
    %85 = vector.extract_strided_slice %53 {offsets = [8, 0], sizes = [8, 32], strides = [1, 1]} : vector<16x32xf32> to vector<8x32xf32>
    %cst_37 = arith.constant dense<0.000000e+00> : vector<8x32xf32>
    %86 = tpu.matmul %84, %85, %cst_37 {dimension_numbers = #tpu.dot_dimension_numbers<[1], [0], [0], [1], [0, 0, 1, 1], [], []>} : vector<8x8xf32>, vector<8x32xf32>, vector<8x32xf32> -> vector<8x32xf32>
    %87 = tpu.concatenate %71, %86 in 0 : vector<8x32xf32>, vector<8x32xf32> -> vector<16x32xf32>
    %88 = arith.addf %87, %53 : vector<16x32xf32>
    %cst_38 = arith.constant dense<0.000000e+00> : vector<16x32xf32>
    %89 = tpu.matmul %88, %4, %cst_38 {dimension_numbers = #tpu.dot_dimension_numbers<[1], [0], [0], [1], [0, 0, 1, 1], [], []>} : vector<16x32xf32>, vector<32x32xf32>, vector<16x32xf32> -> vector<16x32xf32>
    %90 = vector.broadcast %9 : vector<1x32xf32> to vector<16x32xf32>
    %91 = arith.addf %89, %90 : vector<16x32xf32>
    %cst_39 = arith.constant 0.000000e+00 : f32
    %92 = vector.broadcast %cst_39 : f32 to vector<16x32xf32>
    %93 = arith.maximumf %91, %92 : vector<16x32xf32>
    %cst_40 = arith.constant dense<0.000000e+00> : vector<16x128xf32>
    %94 = tpu.matmul %93, %5, %cst_40 {dimension_numbers = #tpu.dot_dimension_numbers<[1], [0], [0], [1], [0, 0, 1, 1], [], []>} : vector<16x32xf32>, vector<32x128xf32>, vector<16x128xf32> -> vector<16x128xf32>
    %95 = vector.broadcast %10 : vector<1x128xf32> to vector<16x128xf32>
    %96 = arith.addf %94, %95 : vector<16x128xf32>
    %c0_41 = arith.constant 0 : index
    %c0_42 = arith.constant 0 : index
    %97 = vector.load %arg5[%c0_41, %c0_42] : memref<16x128xf32, #tpu.memory_space<vmem>>, vector<16x128xf32>
    tpu.vector_store %arg5[%c0_41, %c0_42], %96 {strides = array<i32>} : memref<16x128xf32, #tpu.memory_space<vmem>>, vector<16x128xf32>,
    return
  }
}

</mosaic_0001>

<bundles_post_ra>
// kernel: tpu_custom_call.1
= control target key start
LH: loop header
LB: loop body
LE: loop exit
PB: predicated region body
PF: predicated region fallthrough
CT: control target
= control target key end

     0   :  { %10 = vsyncpa [#allocation3], 0  ;;  %s1957_s0 = inlined_call_operand.hbm [shape: f32[16,32], index: 0, kind: input, shape index: {}]   ;;  %s1958_s1 = inlined_call_operand.hbm [shape: f32[16,64], index: 1, kind: input, shape index: {}]   ;;  %s1959_s2 = inlined_call_operand.hbm [shape: f32[32,128], index: 2, kind: input, shape index: {}]   ;;  %s1960_s3 = inlined_call_operand.hbm [shape: f32[32,160], index: 3, kind: input, shape index: {}]   ;;  %s1961_s4 = inlined_call_operand.vmem [shape: f32[8,128], index: 4, kind: input, shape index: {}]   ;;  %s1962_s5 = inlined_call_operand.hbm [shape: f32[16,128], index: 5, kind: output, shape index: {}]  }
   0x1   :  { %11 = vsyncpa [#allocation6], 0 }
   0x2   :  { %12 = vsyncpa [#allocation9], 0 }
   0x3   :  { %13 = vsyncpa [#allocation4], 0  ;;  %s1721_s18 = smov [#allocation5]   ;;  %s1722_s20 = smov [#allocation2]  }
   0x4   :  { %s31_s19 = sshll.u32 %s1721_s18, 4  ;;  %s19_s21 = sshll.u32 %s1722_s20, 4  ;;  %s32_s19 = int_to_ptr.vmem [resolvable:$true] %s31_s19  ;;  %s1765_s21 = int_to_ptr.vmem [resolvable:$true] %s19_s21 }
   0x5   :  { %s1603_s24 = scalar_lea.hbm %s1958_s1, 256 }
   0x6   :  { %p1604_p0 = scmp.ne.s32.totalorder %s1958_s1, %s1603_s24  ;;  %p1607_p1 = scmp.lt.u32.totalorder %s1603_s24, %s1958_s1 }
   0x8   :  { %p1609_p2 = pnand %p1607_p1, %p1604_p0 }
   0xa   :  { %1612 = shalt.err (!%p1609_p2)
}
   0xb   :  { %s1613_s29 = scalar_lea.vmem %s32_s19, 256  ;;  %p1618_p4 = scmp.lt.s32.totalorder %s32_s19, %s32_s19 }
   0xc   :  { %p1614_p3 = scmp.ne.s32.totalorder %s32_s19, %s1613_s29  ;;  %p1619_p5 = scmp.lt.s32.totalorder %s1613_s29, %s1613_s29 }
   0xe   :  { %p1620_p6 = por %p1619_p5, %p1618_p4 }
  0x10   :  { %p1621_p7 = pnand %p1620_p6, %p1614_p3 }
  0x12   :  { %1624 = shalt.err (!%p1621_p7)
}
  0x13   :  { %s1723_s30 = smov 128   ;;  %s1724_s6 = smov 8  }
  0x14   :  { %37 = dma.hbm_to_vmem [thread:$0]  %s1958_s1, 256, %s32_s19, [#allocation6], %s1723_s30, %s1723_s30, %s1724_s6  }
  0x15   :  { %s1625_s11 = scalar_lea.hbm %s1957_s0, 256 }
  0x16   :  { %p1626_p8 = scmp.ne.s32.totalorder %s1957_s0, %s1625_s11  ;;  %p1629_p9 = scmp.lt.u32.totalorder %s1625_s11, %s1957_s0 }
  0x18   :  { %p1631_p10 = pnand %p1629_p9, %p1626_p8 }
  0x1a   :  { %1634 = shalt.err (!%p1631_p10)
}
  0x1b   :  { %s1635_s16 = scalar_lea.vmem %s1765_s21, 256  ;;  %p1640_p12 = scmp.lt.s32.totalorder %s1765_s21, %s1765_s21 }
  0x1c   :  { %p1636_p11 = scmp.ne.s32.totalorder %s1765_s21, %s1635_s16  ;;  %p1641_p13 = scmp.lt.s32.totalorder %s1635_s16, %s1635_s16 }
  0x1e   :  { %p1642_p0 = por %p1641_p13, %p1640_p12 }
  0x20   :  { %p1643_p1 = pnand %p1642_p0, %p1636_p11 }
  0x22   :  { %1646 = shalt.err (!%p1643_p1)
}
  0x23   :  { %25 = dma.hbm_to_vmem [thread:$0]  %s1957_s0, 256, %s1765_s21, [#allocation3], %s1723_s30, %s1723_s30, %s1724_s6  }
  0x24   :  { %s1725_s18 = smov [#allocation7]   ;;  %s1726_s20 = smov [#allocation8]  }
  0x25   :  { %s43_s19 = sshll.u32 %s1725_s18, 4  ;;  %s55_s22 = sshll.u32 %s1726_s20, 4  ;;  %s44_s19 = int_to_ptr.vmem [resolvable:$true] %s43_s19  ;;  %s1802_s22 = int_to_ptr.vmem [resolvable:$true] %s55_s22 }
  0x26   :  { %s1647_s25 = scalar_lea.hbm %s1959_s2, 512 }
  0x27   :  { %p1648_p2 = scmp.ne.s32.totalorder %s1959_s2, %s1647_s25  ;;  %p1651_p3 = scmp.lt.u32.totalorder %s1647_s25, %s1959_s2 }
  0x29   :  { %p1653_p4 = pnand %p1651_p3, %p1648_p2 }
  0x2b   :  { %1656 = shalt.err (!%p1653_p4)
}
  0x2c   :  { %s1657_s0 = scalar_lea.vmem %s44_s19, 512  ;;  %p1662_p6 = scmp.lt.s32.totalorder %s44_s19, %s44_s19 }
  0x2d   :  { %p1658_p5 = scmp.ne.s32.totalorder %s44_s19, %s1657_s0  ;;  %p1663_p7 = scmp.lt.s32.totalorder %s1657_s0, %s1657_s0 }
  0x2f   :  { %p1664_p8 = por %p1663_p7, %p1662_p6 }
  0x31   :  { %p1665_p9 = pnand %p1664_p8, %p1658_p5 }
  0x33   :  { %1668 = shalt.err (!%p1665_p9)
}
  0x34   :  { %49 = dma.hbm_to_vmem [thread:$0]  %s1959_s2, 512, %s44_s19, [#allocation6], %s1723_s30, %s1723_s30, %s1724_s6  }
  0x35   :  { %s1669_s10 = scalar_lea.hbm %s1960_s3, 1024 }
  0x36   :  { %p1670_p10 = scmp.ne.s32.totalorder %s1960_s3, %s1669_s10  ;;  %p1673_p11 = scmp.lt.u32.totalorder %s1669_s10, %s1960_s3 }
  0x38   :  { %p1675_p12 = pnand %p1673_p11, %p1670_p10 }
  0x3a   :  { %1678 = shalt.err (!%p1675_p12)
}
  0x3b   :  { %s1679_s15 = scalar_lea.vmem %s1802_s22, 1024  ;;  %p1684_p0 = scmp.lt.s32.totalorder %s1802_s22, %s1802_s22 }
  0x3c   :  { %p1680_p13 = scmp.ne.s32.totalorder %s1802_s22, %s1679_s15  ;;  %p1685_p1 = scmp.lt.s32.totalorder %s1679_s15, %s1679_s15 }
  0x3e   :  { %p1686_p2 = por %p1685_p1, %p1684_p0 }
  0x40   :  { %p1687_p3 = pnand %p1686_p2, %p1680_p13 }
  0x42   :  { %1690 = shalt.err (!%p1687_p3)
}
  0x43   :  { %s1727_s2 = smov 256   ;;  %s1728_s16 = smov 16  }
  0x44   :  { %61 = dma.hbm_to_vmem [thread:$0]  %s1960_s3, 1024, %s1802_s22, [#allocation9], %s1727_s2, %s1727_s2, %s1728_s16  }
  0x45   :  { %1713 = dma.done.wait [#allocation3], 256  }
  0x46   :  { %1714 = vsyncadd [#allocation3], 4294967040 }
  0x47   :  { %1715 = dma.done.wait [#allocation6], 768  }
  0x48   :  { %1716 = vsyncadd [#allocation6], 4294966528 }
  0x49   :  { %1717 = dma.done.wait [#allocation9], 1024  }
  0x4a   :  { %1718 = vsyncadd [#allocation9], 4294966272  ;;  %v1729_v0 = vmov 0.0   ;;  %v78_v1 = vld [vmem:[#allocation7] sm:$0xff]  ;;  %v79_v2 = vld [vmem:[#allocation7 + $0x8] sm:$0xff]  ;;  %vm98_vm0 = vcmask 261120  }
  0x4b   :  { %1400 = vmatprep.subr.mxu1 %v1729_v0  ;;  %v80_v3 = vld [vmem:[#allocation7 + $0x10] sm:$0xff]  ;;  %v1495_v4 = vpack.c.bf16 %v79_v2, %v78_v1  ;;  %v81_v5 = vld [vmem:[#allocation7 + $0x18] sm:$0xff]  ;;  %v1837_v6 = vld [vmem:[#allocation2] sm:$0xff]  ;;  %vm1730_vm1 = vmmov 0   ;;  %vm253_vm2 = vcmask 64512   ;;  %v1866_v31 = vpack.i.bf16 %v79_v2, %v78_v1  ;;  %s1731_s3 = smov 96  }
  0x4c   :  { %v94_v7 = vld [vmem:[#allocation5] sm:$0xff]  ;;  %v1499_v8 = vpack.c.bf16 %v81_v5, %v80_v3  ;;  %v1841_v10 = vld [vmem:[#allocation2 + $0x8] sm:$0xff]  ;;  %v1843_v11 = vld [vmem:[#allocation5 + $0x8] sm:$0xff]  ;;  %1402 = vmatprep.mubr.msk.f32.mxu1 %vm1730_vm1, %v1729_v0  ;;  %v1868_v32 = vpack.i.bf16 %v81_v5, %v80_v3  ;;  %s1732_s18 = smov 64   ;;  %s1733_s24 = smov 32  }
  0x4d   :  { %v96_v9 = vadd.f32 %v94_v7, %v1837_v6  ;;  %1496 = vmatprep.subr.bf16.mxu0 %v1495_v4  ;;  %v97_v12 = vadd.f32 %v1843_v11, %v1841_v10  ;;  %v86_v47 = vld [vmem:[#allocation8 + $0x8] sm:$0xff]  ;;  %v87_v48 = vld [vmem:[#allocation8 + $0x18] sm:$0xff]  ;;  %v1317_v62 = vld [vmem:[%s1961_s4] ss:$0 sm:$0xff]  ;;  %s1734_s29 = smov [#allocation10]  }
  0x4e   :  { %1498 = vmatpush3.bf16.msra.mxu0 %v1495_v4  ;;  %v1511_v49 = vpack.c.bf16 %v87_v48, %v86_v47  ;;  %v88_v56 = vld [vmem:[#allocation8 + $0x28] sm:$0xff]  ;;  %v89_v57 = vld [vmem:[#allocation8 + $0x38] sm:$0xff]  ;;  %s1295_s0 = sshll.u32 %s1734_s29, 4  ;;  %s1296_s0 = int_to_ptr.vmem [resolvable:$true] %s1295_s0 }
  0x4f   :  { %1397 = vmatprep.mubr.msk.f32.mxu0 %vm98_vm0, %v96_v9  ;;  %1500 = vmatprep.subr.bf16.mxu0 %v1499_v8  ;;  %v1515_v58 = vpack.c.bf16 %v89_v57, %v88_v56  ;;  %s1691_s21 = scalar_lea.vmem %s1296_s0, 256  ;;  %p1696_p5 = scmp.lt.s32.totalorder %s1296_s0, %s1296_s0 }
  0x50   :  { %1401 = vmatpush3.xpose.msk.msra.mxu1 %vm98_vm0, %v96_v9  ;;  %p1692_p4 = scmp.ne.s32.totalorder %s1296_s0, %s1691_s21  ;;  %p1697_p6 = scmp.lt.s32.totalorder %s1691_s21, %s1691_s21 }
  0x51   :  { %1405 = vmatprep.subr.mxu1 %v1729_v0 }
  0x52   :  { %1502 = vmatpush3.bf16.msra.mxu0 %v1499_v8  ;;  %p1698_p7 = por %p1697_p6, %p1696_p5 }
  0x53   :  { %1410 = vmatprep.subr.mxu0 %v1729_v0 }
  0x54   :  { %p1699_p8 = pnand %p1698_p7, %p1692_p4 }
  0x55   :  { %1398 = vmatmul.mubr.msk.f32.vlgmr.msra.gmra.mrb[0].mxu0 %vm98_vm0, %v97_v12 }
  0x56   :  { %1412 = vmatprep.mubr.msk.f32.mxu0 %vm1730_vm1, %v1729_v0 }
  0x5b   :  { %1411 = vmatpush3.xpose.msk.msra.mxu0 %vm98_vm0, %v97_v12 }
 0x128   :  { %v1399_v13 = vpop.f32.mrb[0].mxu0 }
 0x129   :  { %v171_v14 = vpop.f32.mrb[1].mxu0  ;;  %1413 = vmatmul.mubr.msk.f32.vlgmr.msra.gmra.mrb[2].mxu0 %vm98_vm0, %v1399_v13 }
 0x12a   :  { %1403 = vmatmul.mubr.msk.f32.vlgmr.msra.gmra.mrb[0].mxu1 %vm98_vm0, %v171_v14 }
 0x12b   :  { %1406 = vmatpush3.msra.mxu1 %v1837_v6  ;;  %1407 = vmatprep.mubr.msk.f32.mxu1 %vm1730_vm1, %v1729_v0 }
 0x12c   :  { %1415 = vmatprep.subr.mxu1 %v1729_v0 }
 0x1fc   :  { %v407_v15 = vpop.f32.mrb[2].mxu0 }
 0x1fd   :  { %v249_v16 = vpop.f32.mrb[0].mxu1  ;;  %v1414_v17 = vpop.f32.mrb[3].mxu0  ;;  %v411_v20 = vsel %vm253_vm2, %v407_v15, -inf }
 0x1fe   :  { %v1404_v18 = vpop.f32.mrb[1].mxu1  ;;  %v254_v19 = vsel %vm253_vm2, %v249_v16, -inf }
 0x1ff   :  { %255 = vmax.xlane.f32.xlu0 %v254_v19 }
 0x203   :  { %412 = vmax.xlane.f32.xlu0 %v411_v20 }
 0x219   :  { %1558 = vrot.lane.b32.xlu0 %v1866_v31, %s1731_s3 }
 0x21d   :  { %687 = vrot.lane.b32.xlu0 %v94_v7, %s1731_s3 }
 0x28c   :  { %v256_v21 = vpop.xlane.xlu0 %255 }
 0x28d   :  { %v257_v22 = vsub.f32 %v249_v16, %v256_v21 }
 0x28f   :  { %v258_v23 = vmul.f32 1.442695, %v257_v22 }
 0x290   :  { %v413_v24 = vpop.xlane.xlu0 %412 }
 0x291   :  { %1587 = vpow2.f32 %v258_v23  ;;  %v414_v25 = vsub.f32 %v407_v15, %v413_v24 }
 0x293   :  { %v415_v26 = vmul.f32 1.442695, %v414_v25 }
 0x294   :  { %v1559_v35 = vpop.permute.xlu0 %1558 }
 0x295   :  { %1589 = vpow2.f32 %v415_v26  ;;  %v1561_v36 = vunpack.i.h.bf16 %v1559_v35  ;;  %v1560_v37 = vunpack.i.l.bf16 %v1559_v35 }
 0x297   :  { %v1503_v39 = vpack.c.bf16 %v1561_v36, %v1560_v37 }
 0x298   :  { %v688_v15 = vpop.permute.xlu0 %687 }
 0x299   :  { %1504 = vmatprep.subr.bf16.mxu0 %v1503_v39 }
 0x29a   :  { %1506 = vmatpush3.bf16.msra.mxu0 %v1503_v39 }
 0x29b   :  { %v1588_v27 = vpop.eup %1587 }
 0x29c   :  { %v260_v28 = vsel %vm253_vm2, %v1588_v27, 0.0 }
 0x29d   :  { %261 = vadd.xlane.f32.xlu1 %v260_v28 }
 0x29f   :  { %v1590_v29 = vpop.eup %1589 }
 0x2a0   :  { %v417_v30 = vsel %vm253_vm2, %v1590_v29, 0.0 }
 0x2a1   :  { %418 = vadd.xlane.f32.xlu1 %v417_v30 }
 0x2b2   :  { %1563 = vrot.lane.b32.xlu1 %v1868_v32, %s1731_s3 }
 0x2b6   :  { %1568 = vrot.lane.b32.xlu1 %v1866_v31, %s1732_s18 }
 0x2ba   :  { %1573 = vrot.lane.b32.xlu1 %v1868_v32, %s1732_s18 }
 0x2be   :  { %689 = vrot.lane.b32.xlu1 %v1843_v11, %s1731_s3  ;;  %v1320_v11 = vld [vmem:[%s1961_s4 + $0x1] ss:$0 sm:$0xff] }
 0x32a   :  { %v262_v33 = vpop.xlane.xlu1 %261 }
 0x32b   :  { %1591 = vrcp.f32 %v262_v33 }
 0x32e   :  { %v419_v34 = vpop.xlane.xlu1 %418 }
 0x32f   :  { %1593 = vrcp.f32 %v419_v34 }
 0x332   :  { %v1564_v38 = vpop.permute.xlu1 %1563 }
 0x333   :  { %v1566_v40 = vunpack.i.h.bf16 %v1564_v38  ;;  %v1565_v41 = vunpack.i.l.bf16 %v1564_v38 }
 0x335   :  { %v1592_v42 = vpop.eup %1591  ;;  %v1507_v43 = vpack.c.bf16 %v1566_v40, %v1565_v41 }
 0x336   :  { %v264_v44 = vmul.f32 %v1592_v42, %v1588_v27  ;;  %v1569_v59 = vpop.permute.xlu1 %1568 }
 0x337   :  { %1508 = vmatprep.subr.bf16.mxu0 %v1507_v43  ;;  %v1571_v60 = vunpack.i.h.bf16 %v1569_v59  ;;  %v1570_v61 = vunpack.i.l.bf16 %v1569_v59 }
 0x338   :  { %1408 = vmatmul.mubr.msk.f32.vlgmr.msra.gmra.mrb[2].mxu1 %vm253_vm2, %v264_v44  ;;  %1510 = vmatpush3.bf16.msra.mxu0 %v1507_v43 }
 0x339   :  { %v1594_v45 = vpop.eup %1593  ;;  %1416 = vmatpush3.msra.mxu1 %v1841_v10  ;;  %1417 = vmatprep.mubr.msk.f32.mxu1 %vm1730_vm1, %v1729_v0  ;;  %v1519_v63 = vpack.c.bf16 %v1571_v60, %v1570_v61  ;;  %v84_v60 = vld [vmem:[#allocation8 + $0x20] sm:$0xff]  ;;  %v85_v61 = vld [vmem:[#allocation8 + $0x30] sm:$0xff] }
 0x33a   :  { %v421_v46 = vmul.f32 %v1594_v45, %v1590_v29  ;;  %1512 = vmatprep.subr.bf16.mxu1 %v1511_v49  ;;  %v1574_v1 = vpop.permute.xlu1 %1573 }
 0x33b   :  { %v1576_v3 = vunpack.i.h.bf16 %v1574_v1  ;;  %v1575_v4 = vunpack.i.l.bf16 %v1574_v1  ;;  %1520 = vmatprep.subr.bf16.mxu0 %v1519_v63 }
 0x33c   :  { %1418 = vmatmul.mubr.msk.f32.vlgmr.msra.gmra.mrb[4].mxu1 %vm253_vm2, %v421_v46 }
 0x33d   :  { %1514 = vmatpush3.bf16.msra.mxu1 %v1511_v49  ;;  %v1523_v8 = vpack.c.bf16 %v1576_v3, %v1575_v4 }
 0x33e   :  { %1516 = vmatprep.subr.bf16.mxu1 %v1515_v58  ;;  %v690_v17 = vpop.permute.xlu1 %689 }
 0x341   :  { %1518 = vmatpush3.bf16.msra.mxu1 %v1515_v58 }
 0x342   :  { %1453 = vmatprep.subr.mxu1 %v1729_v0 }
 0x40b   :  { %v334_v50 = vpop.f32.mrb[2].mxu1 }
 0x40c   :  { %v495_v51 = vadd.f32 %v334_v50, %v1837_v6  ;;  %v1409_v52 = vpop.f32.mrb[3].mxu1 }
 0x40d   :  { %v82_v52 = vld [vmem:[#allocation8] sm:$0xff] }
 0x40e   :  { %1428 = vmatprep.mubr.msk.f32.mxu0 %vm98_vm0, %v495_v51 }
 0x40f   :  { %v491_v53 = vpop.f32.mrb[4].mxu1 }
 0x410   :  { %v496_v54 = vadd.f32 %v491_v53, %v1841_v10  ;;  %v1419_v55 = vpop.f32.mrb[5].mxu1  ;;  %v83_v53 = vld [vmem:[#allocation8 + $0x10] sm:$0xff] }
 0x412   :  { %1429 = vmatmul.mubr.msk.f32.vlgmr.msra.gmra.mrb[4].mxu0 %vm98_vm0, %v496_v54  ;;  %v1535_v54 = vpack.c.bf16 %v83_v53, %v82_v52 }
 0x413   :  { %1522 = vmatpush3.bf16.msra.mxu0 %v1519_v63  ;;  %v1331_v63 = vld [vmem:[%s1961_s4 + $0x2] ss:$0 sm:$0xff] }
 0x414   :  { %1524 = vmatprep.subr.bf16.mxu0 %v1523_v8 }
 0x417   :  { %1526 = vmatpush3.bf16.msra.mxu0 %v1523_v8 }
 0x418   :  { %1463 = vmatprep.subr.mxu0 %v1729_v0 }
 0x4e5   :  { %v1430_v2 = vpop.f32.mrb[4].mxu0 }
 0x4e6   :  { %v595_v5 = vadd.f32 %v1430_v2, %v1317_v62  ;;  %v589_v6 = vpop.f32.mrb[5].mxu0 }
 0x4e7   :  { %v590_v7 = vadd.f32 %v1317_v62, %v589_v6  ;;  %v1539_v62 = vpack.c.bf16 %v85_v61, %v84_v60 }
 0x4e8   :  { %v599_v10 = vmax.f32 %v595_v5, 0.0 }
 0x4e9   :  { %v598_v9 = vmax.f32 %v590_v7, 0.0  ;;  %v1334_v7 = vld [vmem:[%s1961_s4 + $0x3] ss:$0 sm:$0xff] }
 0x4eb   :  { %1439 = vmatprep.mubr.msk.f32.mxu1 %vm98_vm0, %v598_v9 }
 0x4ec   :  { %1440 = vmatmul.mubr.msk.f32.vlgmr.msra.gmra.mrb[6].mxu1 %vm98_vm0, %v599_v10 }
 0x4ed   :  { %1455 = vmatprep.mubr.msk.f32.mxu1 %vm1730_vm1, %v1729_v0 }
 0x5bf   :  { %v1441_v12 = vpop.f32.mrb[6].mxu1 }
 0x5c0   :  { %v1900_v13 = vadd.f32 %v1441_v12, %v1320_v11  ;;  %v676_v14 = vpop.f32.mrb[7].mxu1 }
 0x5c1   :  { %v1902_v16 = vadd.f32 %v1320_v11, %v676_v14 }
 0x5c2   :  { %v694_v19 = vadd.f32 %v690_v17, %v1900_v13 }
 0x5c3   :  { %v693_v18 = vadd.f32 %v688_v15, %v1902_v16 }
 0x5c5   :  { %1450 = vmatprep.mubr.msk.f32.mxu0 %vm98_vm0, %v693_v18  ;;  %1454 = vmatpush3.xpose.msk.msra.mxu1 %vm98_vm0, %v693_v18 }
 0x5c6   :  { %1451 = vmatmul.mubr.msk.f32.vlgmr.msra.gmra.mrb[6].mxu0 %vm98_vm0, %v694_v19  ;;  %1458 = vmatprep.subr.mxu1 %v1729_v0 }
 0x5c7   :  { %1464 = vmatpush3.xpose.msk.msra.mxu0 %vm98_vm0, %v694_v19  ;;  %1465 = vmatprep.mubr.msk.f32.mxu0 %vm1730_vm1, %v1729_v0 }
 0x699   :  { %v1452_v20 = vpop.f32.mrb[6].mxu0 }
 0x69a   :  { %v779_v21 = vpop.f32.mrb[7].mxu0  ;;  %1466 = vmatmul.mubr.msk.f32.vlgmr.msra.gmra.mrb[8].mxu0 %vm98_vm0, %v1452_v20 }
 0x69b   :  { %1456 = vmatmul.mubr.msk.f32.vlgmr.msra.gmra.mrb[8].mxu1 %vm98_vm0, %v779_v21 }
 0x69c   :  { %1459 = vmatpush3.msra.mxu1 %v1902_v16  ;;  %1460 = vmatprep.mubr.msk.f32.mxu1 %vm1730_vm1, %v1729_v0 }
 0x69d   :  { %1468 = vmatprep.subr.mxu1 %v1729_v0 }
 0x76d   :  { %v1014_v22 = vpop.f32.mrb[8].mxu0 }
 0x76e   :  { %v857_v23 = vpop.f32.mrb[8].mxu1  ;;  %v1467_v24 = vpop.f32.mrb[9].mxu0  ;;  %v1018_v25 = vsel %vm253_vm2, %v1014_v22, -inf }
 0x76f   :  { %1019 = vmax.xlane.f32.xlu1 %v1018_v25  ;;  %v1457_v26 = vpop.f32.mrb[9].mxu1  ;;  %v861_v27 = vsel %vm253_vm2, %v857_v23, -inf }
 0x770   :  { %862 = vmax.xlane.f32.xlu0 %v861_v27 }
 0x780   :  { %1583 = vrot.lane.b32.xlu1 %v1868_v32, %s1733_s24 }
 0x7fc   :  { %v1020_v28 = vpop.xlane.xlu1 %1019 }
 0x7fd   :  { %v1021_v29 = vsub.f32 %v1014_v22, %v1020_v28  ;;  %v863_v30 = vpop.xlane.xlu0 %862 }
 0x7fe   :  { %v864_v33 = vsub.f32 %v857_v23, %v863_v30 }
 0x7ff   :  { %v1022_v34 = vmul.f32 1.442695, %v1021_v29 }
 0x800   :  { %v865_v35 = vmul.f32 1.442695, %v864_v33  ;;  %v1584_v42 = vpop.permute.xlu1 %1583 }
 0x801   :  { %v1586_v44 = vunpack.i.h.bf16 %v1584_v42  ;;  %v1585_v45 = vunpack.i.l.bf16 %v1584_v42 }
 0x802   :  { %1595 = vpow2.f32 %v865_v35 }
 0x803   :  { %1597 = vpow2.f32 %v1022_v34  ;;  %v1531_v51 = vpack.c.bf16 %v1586_v44, %v1585_v45 }
 0x80c   :  { %v1596_v36 = vpop.eup %1595 }
 0x80d   :  { %v867_v37 = vsel %vm253_vm2, %v1596_v36, 0.0  ;;  %v1598_v38 = vpop.eup %1597 }
 0x80e   :  { %868 = vadd.xlane.f32.xlu0 %v867_v37  ;;  %v1024_v39 = vsel %vm253_vm2, %v1598_v38, 0.0 }
 0x812   :  { %1025 = vadd.xlane.f32.xlu0 %v1024_v39 }
 0x828   :  { %1578 = vrot.lane.b32.xlu0 %v1866_v31, %s1733_s24 }
 0x89b   :  { %v869_v40 = vpop.xlane.xlu0 %868 }
 0x89c   :  { %1599 = vrcp.f32 %v869_v40 }
 0x89f   :  { %v1026_v41 = vpop.xlane.xlu0 %1025 }
 0x8a0   :  { %1601 = vrcp.f32 %v1026_v41 }
 0x8a3   :  { %v1579_v43 = vpop.permute.xlu0 %1578 }
 0x8a4   :  { %v1581_v46 = vunpack.i.h.bf16 %v1579_v43  ;;  %v1580_v47 = vunpack.i.l.bf16 %v1579_v43 }
 0x8a6   :  { %v1600_v48 = vpop.eup %1599  ;;  %v1527_v49 = vpack.c.bf16 %v1581_v46, %v1580_v47 }
 0x8a7   :  { %v871_v50 = vmul.f32 %v1600_v48, %v1596_v36 }
 0x8a8   :  { %1528 = vmatprep.subr.bf16.mxu0 %v1527_v49 }
 0x8a9   :  { %1461 = vmatmul.mubr.msk.f32.vlgmr.msra.gmra.mrb[10].mxu1 %vm253_vm2, %v871_v50  ;;  %1530 = vmatpush3.bf16.msra.mxu0 %v1527_v49 }
 0x8aa   :  { %v1602_v31 = vpop.eup %1601  ;;  %1469 = vmatpush3.msra.mxu1 %v1900_v13  ;;  %1470 = vmatprep.mubr.msk.f32.mxu1 %vm1730_vm1, %v1729_v0 }
 0x8ab   :  { %v1028_v32 = vmul.f32 %v1602_v31, %v1598_v38  ;;  %1532 = vmatprep.subr.bf16.mxu0 %v1531_v51  ;;  %1536 = vmatprep.subr.bf16.mxu1 %v1535_v54 }
 0x8ad   :  { %1471 = vmatmul.mubr.msk.f32.vlgmr.msra.gmra.mrb[12].mxu1 %vm253_vm2, %v1028_v32  ;;  %1534 = vmatpush3.bf16.msra.mxu0 %v1531_v51 }
 0x8ae   :  { %1538 = vmatpush3.bf16.msra.mxu1 %v1535_v54 }
 0x8af   :  { %1540 = vmatprep.subr.bf16.mxu1 %v1539_v62 }
 0x8b2   :  { %1542 = vmatpush3.bf16.msra.mxu1 %v1539_v62 }
 0x97c   :  { %v941_v55 = vpop.f32.mrb[10].mxu1 }
 0x97d   :  { %v1102_v56 = vadd.f32 %v941_v55, %v1902_v16  ;;  %v1462_v57 = vpop.f32.mrb[11].mxu1 }
 0x97f   :  { %1481 = vmatprep.mubr.msk.f32.mxu0 %vm98_vm0, %v1102_v56 }
 0x980   :  { %v1098_v58 = vpop.f32.mrb[12].mxu1 }
 0x981   :  { %v1103_v59 = vadd.f32 %v1098_v58, %v1900_v13  ;;  %v1472_v0 = vpop.f32.mrb[13].mxu1 }
 0x983   :  { %1482 = vmatmul.mubr.msk.f32.vlgmr.msra.gmra.mrb[10].mxu0 %vm98_vm0, %v1103_v59 }
 0xa56   :  { %v1483_v1 = vpop.f32.mrb[10].mxu0 }
 0xa57   :  { %v1198_v2 = vadd.f32 %v1483_v1, %v1331_v63  ;;  %v1192_v3 = vpop.f32.mrb[11].mxu0 }
 0xa58   :  { %v1193_v4 = vadd.f32 %v1331_v63, %v1192_v3 }
 0xa59   :  { %v1202_v6 = vmax.f32 %v1198_v2, 0.0 }
 0xa5a   :  { %v1201_v5 = vmax.f32 %v1193_v4, 0.0 }
 0xa5c   :  { %1492 = vmatprep.mubr.msk.f32.mxu1 %vm98_vm0, %v1201_v5 }
 0xa5d   :  { %1493 = vmatmul.mubr.msk.f32.vlgmr.msra.gmra.mrb[14].mxu1 %vm98_vm0, %v1202_v6 }
 0xb30   :  { %v1494_v8 = vpop.f32.mrb[14].mxu1 }
 0xb31   :  { %v1285_v9 = vadd.f32 %v1494_v8, %v1334_v7  ;;  %v1279_v10 = vpop.f32.mrb[15].mxu1 }
 0xb32   :  { %v1280_v11 = vadd.f32 %v1334_v7, %v1279_v10 }
 0xb33   :  { %1289 = vst [vmem:[#allocation10 + $0x8] sm:$0xff] %v1285_v9 }
 0xb34   :  { %1288 = vst [vmem:[#allocation10] sm:$0xff] %v1280_v11 }
 0xb35   :  { %1702 = shalt.err (!%p1699_p8)
}
 0xb36   :  { %s1703_s4 = scalar_lea.hbm %s1962_s5, 256 }
 0xb37   :  { %p1704_p9 = scmp.ne.s32.totalorder %s1962_s5, %s1703_s4  ;;  %p1707_p10 = scmp.lt.u32.totalorder %s1703_s4, %s1962_s5 }
 0xb39   :  { %p1709_p11 = pnand %p1707_p10, %p1704_p9 }
 0xb3b   :  { %1712 = shalt.err (!%p1709_p11)
}
 0xb3c   :  { %1301 = dma.vmem_to_hbm [thread:$0]  %s1296_s0, 256, %s1962_s5, [#allocation4], %s1723_s30, %s1723_s30, %s1724_s6  }
 0xb3d   :  { %1719 = dma.done.wait [#allocation4], 256  }
 0xb3e   :  { %1720 = vsyncadd [#allocation4], 4294967040 }
 0xb3f   :  { %1305 = vsyncpa [#allocation3], 1 }
 0xb40   :  { %1306 = vsyncpa [#allocation6], 1 }
 0xb41   :  { %1307 = vsyncpa [#allocation9], 1 }
 0xb42   :  { %1308 = vsyncpa [#allocation4], 1 }

</bundles_post_ra>
